<compile_context>
chip_gen: v5e
topology: v5e:2x2
jax: 0.10.0
libtpu: 0.0.40
codegen_flags: <defaults>
</compile_context>

<pallas_src>
import functools

import jax
import jax.numpy as jnp
from jax.experimental import pallas as pl
from jax.experimental.pallas import tpu as pltpu


def _round_up(x, m):
    return ((x + m - 1) // m) * m


def _tversky_kernel(logits_ref, targets_ref, out_ref,
                    tp_ref, sp_ref, cnt_ref,
                    *, n_valid, alpha, beta, smooth, num_classes):
    i = pl.program_id(0)
    C, blk = logits_ref.shape

    # Zero the per-class/per-lane accumulators on the first reduction step.
    @pl.when(i == 0)
    def _():
        tp_ref[...] = jnp.zeros_like(tp_ref)
        sp_ref[...] = jnp.zeros_like(sp_ref)
        cnt_ref[...] = jnp.zeros_like(cnt_ref)

    x = logits_ref[...].astype(jnp.float32)                  # (C, blk)

    # Softmax over the class axis (sublanes) — dim=1 of the original (N, C).
    m = jnp.max(x, axis=0, keepdims=True)                    # (1, blk)
    e = jnp.exp(x - m)                                       # (C, blk)
    denom = jnp.sum(e, axis=0, keepdims=True)                # (1, blk)
    preds = e * pl.reciprocal(denom, approx=False)           # (C, blk)

    # Mask padded batch columns (N padded up to a multiple of block_n).
    col = jax.lax.broadcasted_iota(jnp.int32, (C, blk), 1) + i * blk
    valid = (col < n_valid).astype(jnp.float32)              # (C, blk)

    # One-hot targets via iota compare; (1, blk) targets broadcast over C.
    cls_ids = jax.lax.broadcasted_iota(jnp.int32, (C, blk), 0)
    onehot = (targets_ref[...] == cls_ids).astype(jnp.float32) * valid

    preds_v = preds * valid

    # Hot loop: pure elementwise accumulation (no per-step cross-lane reduce).
    tp_ref[...] += preds_v * onehot        # true positives (per class, per lane)
    sp_ref[...] += preds_v                 # sum of preds    (per class, per lane)
    cnt_ref[...] += onehot                 # class counts    (per class, per lane)

    # Final step: single cross-lane reduce + Tversky index + mean over classes.
    @pl.when(i == pl.num_programs(0) - 1)
    def _():
        tp = jnp.sum(tp_ref[...], axis=1, keepdims=True)     # (C, 1)
        sp = jnp.sum(sp_ref[...], axis=1, keepdims=True)     # (C, 1)
        cnt = jnp.sum(cnt_ref[...], axis=1, keepdims=True)   # (C, 1)
        fp = sp - tp
        fn = cnt - tp
        tversky = (tp + smooth) / (tp + alpha * fp + beta * fn + smooth)
        loss = jnp.sum(1.0 - tversky, axis=0, keepdims=True) / float(num_classes)
        out_ref[...] = loss                                  # (1, 1)


def tversky_loss(logits, targets, alpha, beta, smooth=1e-6, block_n=512):
    """Pallas TPU implementation of TverskyLoss.forward."""
    N, C = logits.shape

    # Choose a lane tile: multiple of 128, capped by a conservative VMEM budget
    # (2 double-buffered input tiles + 3 accumulators, all f32).
    vmem_budget = 24 * 1024 * 1024
    max_bn = max(128, (vmem_budget // (5 * 4 * C)) // 128 * 128)
    block_n = min(max(128, _round_up(block_n, 128)), max_bn)
    block_n = min(block_n, _round_up(N, 128))
    n_pad = _round_up(N, block_n)

    # Lane-dense layout: classes -> sublanes, batch -> lanes.
    logits_t = jnp.pad(jnp.transpose(logits).astype(jnp.float32),
                       ((0, 0), (0, n_pad - N)))              # (C, n_pad)
    targets_row = jnp.pad(targets.astype(jnp.int32), (0, n_pad - N),
                          constant_values=-1).reshape(1, n_pad)

    out = pl.pallas_call(
        functools.partial(_tversky_kernel,
                          n_valid=N, alpha=float(alpha), beta=float(beta),
                          smooth=float(smooth), num_classes=C),
        out_shape=jax.ShapeDtypeStruct((1, 1), jnp.float32),
        grid_spec=pltpu.PrefetchScalarGridSpec(
            num_scalar_prefetch=0,
            grid=(n_pad // block_n,),
            in_specs=[
                pl.BlockSpec((C, block_n), lambda i: (0, i)),   # logits (C, N) tiles
                pl.BlockSpec((1, block_n), lambda i: (0, i)),   # targets (1, N) tiles
            ],
            out_specs=pl.BlockSpec((1, 1), lambda i: (0, 0)),   # scalar loss
            scratch_shapes=[
                pltpu.VMEM((C, block_n), jnp.float32),   # TP accumulator
                pltpu.VMEM((C, block_n), jnp.float32),   # sum(preds) accumulator
                pltpu.VMEM((C, block_n), jnp.float32),   # class-count accumulator
            ],
        ),
        compiler_params=pltpu.CompilerParams(
            dimension_semantics=("arbitrary",),          # sequential batch reduction
        ),
    )(logits_t, targets_row)
    # TODO(synk): on v7x, shard the batch reduction across the 2 TensorCores via a
    # leading "parallel" grid axis emitting per-core partials (perf-only change).
    return out[0, 0]


def tversky_loss_ref(logits, targets, alpha, beta, smooth=1e-6):
    """Pure-JAX reference matching the PyTorch module exactly."""
    preds = jax.nn.softmax(logits.astype(jnp.float32), axis=1)
    onehot = jax.nn.one_hot(targets, logits.shape[1], dtype=jnp.float32)
    tp = jnp.sum(preds * onehot, axis=0)
    fp = jnp.sum(preds * (1.0 - onehot), axis=0)
    fn = jnp.sum((1.0 - preds) * onehot, axis=0)
    tversky = (tp + smooth) / (tp + alpha * fp + beta * fn + smooth)
    return jnp.mean(1.0 - tversky)


if __name__ == "__main__":
    key = jax.random.PRNGKey(0)
    k_logits, k_targets = jax.random.split(key)

    N, C = 16, 4                                   # batch of 16 samples, 4 classes
    alpha, beta = 0.7, 0.3
    logits = jax.random.normal(k_logits, (N, C), dtype=jnp.float32)
    targets = jax.random.randint(k_targets, (N,), 0, C, dtype=jnp.int32)

    loss = tversky_loss(logits, targets, alpha, beta)
    loss = jax.block_until_ready(loss)

    ref = tversky_loss_ref(logits, targets, alpha, beta)
    assert jnp.allclose(loss, ref, atol=1e-5, rtol=1e-5), (loss, ref)

    print("KERNEL_OK")
</pallas_src>

<mosaic_0001>
module attributes {stable_mosaic.version = 11 : i64} {
  func.func @_tversky_kernel(%arg0: i32, %arg1: memref<4x128xf32, #tpu.memory_space<vmem>>, %arg2: memref<1x128xi32, #tpu.memory_space<vmem>>, %arg3: memref<1x1xf32, #tpu.memory_space<vmem>>, %arg4: memref<4x128xf32, #tpu.memory_space<vmem>>, %arg5: memref<4x128xf32, #tpu.memory_space<vmem>>, %arg6: memref<4x128xf32, #tpu.memory_space<vmem>>) attributes {dimension_semantics = [#tpu.dimension_semantics<arbitrary>], iteration_bounds = array<i64: 1>, scalar_prefetch = 0 : i64, scratch_operands = 3 : i64, tpu.core_type = #tpu.core_type<tc>, window_params = [{transform_indices = @transform_0, window_bounds = array<i64: 4, 128>}, {transform_indices = @transform_1, window_bounds = array<i64: 1, 128>}, {pipeline_mode = #tpu.pipeline_mode<synchronous>, transform_indices = @transform_2, window_bounds = array<i64: 1, 1>}]} {
    %c0_i32 = arith.constant 0 : i32
    %0 = arith.cmpi eq, %arg0, %c0_i32 : i32
    %1 = arith.extui %0 : i1 to i32
    %c0_i32_0 = arith.constant 0 : i32
    %2 = arith.cmpi ne, %1, %c0_i32_0 : i32
    scf.if %2 {
      %cst_19 = arith.constant 0.000000e+00 : f32
      %43 = vector.broadcast %cst_19 : f32 to vector<4x128xf32>
      %c0_20 = arith.constant 0 : index
      %c0_21 = arith.constant 0 : index
      %44 = vector.load %arg4[%c0_20, %c0_21] : memref<4x128xf32, #tpu.memory_space<vmem>>, vector<4x128xf32>
      tpu.vector_store %arg4[%c0_20, %c0_21], %43 {strides = array<i32>} : memref<4x128xf32, #tpu.memory_space<vmem>>, vector<4x128xf32>,
      %cst_22 = arith.constant 0.000000e+00 : f32
      %45 = vector.broadcast %cst_22 : f32 to vector<4x128xf32>
      %c0_23 = arith.constant 0 : index
      %c0_24 = arith.constant 0 : index
      %46 = vector.load %arg5[%c0_23, %c0_24] : memref<4x128xf32, #tpu.memory_space<vmem>>, vector<4x128xf32>
      tpu.vector_store %arg5[%c0_23, %c0_24], %45 {strides = array<i32>} : memref<4x128xf32, #tpu.memory_space<vmem>>, vector<4x128xf32>,
      %cst_25 = arith.constant 0.000000e+00 : f32
      %47 = vector.broadcast %cst_25 : f32 to vector<4x128xf32>
      %c0_26 = arith.constant 0 : index
      %c0_27 = arith.constant 0 : index
      %48 = vector.load %arg6[%c0_26, %c0_27] : memref<4x128xf32, #tpu.memory_space<vmem>>, vector<4x128xf32>
      tpu.vector_store %arg6[%c0_26, %c0_27], %47 {strides = array<i32>} : memref<4x128xf32, #tpu.memory_space<vmem>>, vector<4x128xf32>,
    } else {
    }
    %c0 = arith.constant 0 : index
    %c0_1 = arith.constant 0 : index
    %3 = vector.load %arg1[%c0, %c0_1] : memref<4x128xf32, #tpu.memory_space<vmem>>, vector<4x128xf32>
    %cst = arith.constant dense<0xFF800000> : vector<128xf32>
    %4 = vector.multi_reduction <maximumf>, %3, %cst [0] : vector<4x128xf32> to vector<128xf32>
    %5 = vector.shape_cast %4 : vector<128xf32> to vector<1x128xf32>
    %6 = vector.broadcast %5 : vector<1x128xf32> to vector<4x128xf32>
    %7 = arith.subf %3, %6 : vector<4x128xf32>
    %8 = math.exp %7 : vector<4x128xf32>
    %cst_2 = arith.constant dense<0.000000e+00> : vector<128xf32>
    %9 = vector.multi_reduction <add>, %8, %cst_2 [0] : vector<4x128xf32> to vector<128xf32>
    %10 = vector.shape_cast %9 : vector<128xf32> to vector<1x128xf32>
    %11 = tpu.reciprocal %10 : vector<1x128xf32> -> vector<1x128xf32>
    %12 = vector.broadcast %11 : vector<1x128xf32> to vector<4x128xf32>
    %13 = arith.mulf %8, %12 : vector<4x128xf32>
    %14 = tpu.iota {dimensions = array<i32: 1>} : vector<4x128xi32>
    %c128_i32 = arith.constant 128 : i32
    %15 = arith.muli %arg0, %c128_i32 : i32
    %16 = vector.broadcast %15 : i32 to vector<4x128xi32>
    %17 = arith.addi %14, %16 : vector<4x128xi32>
    %c16_i32 = arith.constant 16 : i32
    %18 = vector.broadcast %c16_i32 : i32 to vector<4x128xi32>
    %19 = arith.cmpi slt, %17, %18 : vector<4x128xi32>
    %20 = arith.extui %19 : vector<4x128xi1> to vector<4x128xi32>
    %21 = arith.sitofp %20 : vector<4x128xi32> to vector<4x128xf32>
    %22 = tpu.iota {dimensions = array<i32: 0>} : vector<4x128xi32>
    %c0_3 = arith.constant 0 : index
    %c0_4 = arith.constant 0 : index
    %23 = vector.load %arg2[%c0_3, %c0_4] : memref<1x128xi32, #tpu.memory_space<vmem>>, vector<1x128xi32>
    %24 = vector.broadcast %23 : vector<1x128xi32> to vector<4x128xi32>
    %25 = arith.cmpi eq, %24, %22 : vector<4x128xi32>
    %26 = arith.extui %25 : vector<4x128xi1> to vector<4x128xi32>
    %27 = arith.sitofp %26 : vector<4x128xi32> to vector<4x128xf32>
    %28 = arith.mulf %27, %21 : vector<4x128xf32>
    %29 = arith.mulf %13, %21 : vector<4x128xf32>
    %c0_5 = arith.constant 0 : index
    %c0_6 = arith.constant 0 : index
    %30 = vector.load %arg4[%c0_5, %c0_6] : memref<4x128xf32, #tpu.memory_space<vmem>>, vector<4x128xf32>
    %31 = arith.mulf %29, %28 : vector<4x128xf32>
    %32 = arith.addf %30, %31 : vector<4x128xf32>
    %c0_7 = arith.constant 0 : index
    %c0_8 = arith.constant 0 : index
    %33 = vector.load %arg4[%c0_7, %c0_8] : memref<4x128xf32, #tpu.memory_space<vmem>>, vector<4x128xf32>
    tpu.vector_store %arg4[%c0_7, %c0_8], %32 {strides = array<i32>} : memref<4x128xf32, #tpu.memory_space<vmem>>, vector<4x128xf32>,
    %c0_9 = arith.constant 0 : index
    %c0_10 = arith.constant 0 : index
    %34 = vector.load %arg5[%c0_9, %c0_10] : memref<4x128xf32, #tpu.memory_space<vmem>>, vector<4x128xf32>
    %35 = arith.addf %34, %29 : vector<4x128xf32>
    %c0_11 = arith.constant 0 : index
    %c0_12 = arith.constant 0 : index
    %36 = vector.load %arg5[%c0_11, %c0_12] : memref<4x128xf32, #tpu.memory_space<vmem>>, vector<4x128xf32>
    tpu.vector_store %arg5[%c0_11, %c0_12], %35 {strides = array<i32>} : memref<4x128xf32, #tpu.memory_space<vmem>>, vector<4x128xf32>,
    %c0_13 = arith.constant 0 : index
    %c0_14 = arith.constant 0 : index
    %37 = vector.load %arg6[%c0_13, %c0_14] : memref<4x128xf32, #tpu.memory_space<vmem>>, vector<4x128xf32>
    %38 = arith.addf %37, %28 : vector<4x128xf32>
    %c0_15 = arith.constant 0 : index
    %c0_16 = arith.constant 0 : index
    %39 = vector.load %arg6[%c0_15, %c0_16] : memref<4x128xf32, #tpu.memory_space<vmem>>, vector<4x128xf32>
    tpu.vector_store %arg6[%c0_15, %c0_16], %38 {strides = array<i32>} : memref<4x128xf32, #tpu.memory_space<vmem>>, vector<4x128xf32>,
    %c0_i32_17 = arith.constant 0 : i32
    %40 = arith.cmpi eq, %arg0, %c0_i32_17 : i32
    %41 = arith.extui %40 : i1 to i32
    %c0_i32_18 = arith.constant 0 : i32
    %42 = arith.cmpi ne, %41, %c0_i32_18 : i32
    scf.if %42 {
      %c0_19 = arith.constant 0 : index
      %c0_20 = arith.constant 0 : index
      %43 = vector.load %arg4[%c0_19, %c0_20] : memref<4x128xf32, #tpu.memory_space<vmem>>, vector<4x128xf32>
      %cst_21 = arith.constant dense<0.000000e+00> : vector<4xf32>
      %44 = vector.multi_reduction <add>, %43, %cst_21 [1] : vector<4x128xf32> to vector<4xf32>
      %45 = vector.shape_cast %44 : vector<4xf32> to vector<4x1xf32>
      %c0_22 = arith.constant 0 : index
      %c0_23 = arith.constant 0 : index
      %46 = vector.load %arg5[%c0_22, %c0_23] : memref<4x128xf32, #tpu.memory_space<vmem>>, vector<4x128xf32>
      %cst_24 = arith.constant dense<0.000000e+00> : vector<4xf32>
      %47 = vector.multi_reduction <add>, %46, %cst_24 [1] : vector<4x128xf32> to vector<4xf32>
      %48 = vector.shape_cast %47 : vector<4xf32> to vector<4x1xf32>
      %c0_25 = arith.constant 0 : index
      %c0_26 = arith.constant 0 : index
      %49 = vector.load %arg6[%c0_25, %c0_26] : memref<4x128xf32, #tpu.memory_space<vmem>>, vector<4x128xf32>
      %cst_27 = arith.constant dense<0.000000e+00> : vector<4xf32>
      %50 = vector.multi_reduction <add>, %49, %cst_27 [1] : vector<4x128xf32> to vector<4xf32>
      %51 = vector.shape_cast %50 : vector<4xf32> to vector<4x1xf32>
      %52 = arith.subf %48, %45 : vector<4x1xf32>
      %53 = arith.subf %51, %45 : vector<4x1xf32>
      %cst_28 = arith.constant 9.99999997E-7 : f32
      %54 = vector.broadcast %cst_28 : f32 to vector<4x1xf32>
      %55 = arith.addf %45, %54 : vector<4x1xf32>
      %cst_29 = arith.constant 0.699999988 : f32
      %56 = vector.broadcast %cst_29 : f32 to vector<4x1xf32>
      %57 = arith.mulf %56, %52 : vector<4x1xf32>
      %58 = arith.addf %45, %57 : vector<4x1xf32>
      %cst_30 = arith.constant 3.000000e-01 : f32
      %59 = vector.broadcast %cst_30 : f32 to vector<4x1xf32>
      %60 = arith.mulf %59, %53 : vector<4x1xf32>
      %61 = arith.addf %58, %60 : vector<4x1xf32>
      %cst_31 = arith.constant 9.99999997E-7 : f32
      %62 = vector.broadcast %cst_31 : f32 to vector<4x1xf32>
      %63 = arith.addf %61, %62 : vector<4x1xf32>
      %64 = arith.divf %55, %63 : vector<4x1xf32>
      %cst_32 = arith.constant 1.000000e+00 : f32
      %65 = vector.broadcast %cst_32 : f32 to vector<4x1xf32>
      %66 = arith.subf %65, %64 : vector<4x1xf32>
      %cst_33 = arith.constant dense<0.000000e+00> : vector<1xf32>
      %67 = vector.multi_reduction <add>, %66, %cst_33 [0] : vector<4x1xf32> to vector<1xf32>
      %68 = vector.shape_cast %67 : vector<1xf32> to vector<1x1xf32>
      %cst_34 = arith.constant 4.000000e+00 : f32
      %69 = vector.broadcast %cst_34 : f32 to vector<1x1xf32>
      %70 = arith.divf %68, %69 : vector<1x1xf32>
      %c0_35 = arith.constant 0 : index
      %c0_36 = arith.constant 0 : index
      %71 = vector.load %arg3[%c0_35, %c0_36] : memref<1x1xf32, #tpu.memory_space<vmem>>, vector<1x1xf32>
      tpu.vector_store %arg3[%c0_35, %c0_36], %70 {strides = array<i32>} : memref<1x1xf32, #tpu.memory_space<vmem>>, vector<1x1xf32>,
    } else {
    }
    return
  }
  func.func @transform_0(%arg0: i32) -> (i32, i32) {
    %c0_i32 = arith.constant 0 : i32
    %c0_i32_0 = arith.constant 0 : i32
    return %c0_i32, %arg0 : i32, i32
  }
  func.func @transform_1(%arg0: i32) -> (i32, i32) {
    %c0_i32 = arith.constant 0 : i32
    %c0_i32_0 = arith.constant 0 : i32
    return %c0_i32, %arg0 : i32, i32
  }
  func.func @transform_2(%arg0: i32) -> (i32, i32) {
    %c0_i32 = arith.constant 0 : i32
    %c0_i32_0 = arith.constant 0 : i32
    %c0_i32_1 = arith.constant 0 : i32
    return %c0_i32, %c0_i32_0 : i32, i32
  }
}

</mosaic_0001>

<bundles_post_ra>
// kernel: tpu_custom_call.1
= control target key start
LH: loop header
LB: loop body
LE: loop exit
PB: predicated region body
PF: predicated region fallthrough
CT: control target
= control target key end

     0   :  { %7 = vsyncpa [#allocation6], 0  ;;  %s311_s0 = inlined_call_operand.hbm [shape: f32[4,128], index: 0, kind: input, shape index: {}]   ;;  %s312_s1 = inlined_call_operand.hbm [shape: s32[1,128], index: 1, kind: input, shape index: {}]   ;;  %s313_s2 = inlined_call_operand.hbm [shape: f32[1,1], index: 2, kind: output, shape index: {}]  }
   0x1   :  { %8 = vsyncpa [#allocation9], 0 }
   0x2   :  { %9 = vsyncpa [#allocation7], 0  ;;  %s15_s11 = sshll.u32 %s311_s0, 4  ;;  %s276_s12 = smov [#allocation5]   ;;  %s16_s11 = int_to_ptr.hbm [resolvable:$true] %s15_s11 }
   0x3   :  { %s17_s13 = sshll.u32 %s276_s12, 4  ;;  %s26_s16 = sshll.u32 %s312_s1, 4  ;;  %s18_s13 = int_to_ptr.vmem [resolvable:$true] %s17_s13  ;;  %s27_s16 = int_to_ptr.hbm [resolvable:$true] %s26_s16 }
   0x4   :  { %20 = dma.hbm_to_vmem [thread:$0]  %s16_s11, 64, %s18_s13, [#allocation6]  }
   0x5   :  { %s277_s17 = smov [#allocation8]  }
   0x6   :  { %s28_s18 = sshll.u32 %s277_s17, 4  ;;  %s29_s18 = int_to_ptr.vmem [resolvable:$true] %s28_s18 }
   0x7   :  { %31 = dma.hbm_to_vmem [thread:$0]  %s27_s16, 16, %s29_s18, [#allocation9]  }
   0x8   :  { %270 = dma.done.wait [#allocation6], 64  }
   0x9   :  { %271 = vsyncadd [#allocation6], 4294967232 }
   0xa   :  { %272 = dma.done.wait [#allocation9], 16  }
   0xb   :  { %273 = vsyncadd [#allocation9], 4294967280  ;;  %v278_v0 = vmov 0.0   ;;  %vm48_vm0 = vcmask 1043456   ;;  %v47_v1 = vld [vmem:[#allocation5] sm:$0xf]  ;;  %v81_v11 = vlaneseq }
   0xc   :  { %44 = vst [vmem:[#allocation2] sm:$0xf] %v278_v0  ;;  %v49_v2 = vsel %vm48_vm0, %v47_v1, -inf  ;;  %v189_v14 = vld [vmem:[#allocation8] ss:$0 sm:$0xff]  ;;  %v279_v62 = vmov 4.0  }
   0xd   :  { %45 = vst [vmem:[#allocation3] sm:$0xf] %v278_v0  ;;  %v50_v3 = vrot.slane %v49_v2, 4  ;;  %v82_v12 = vand.u32 127, %v81_v11  ;;  %v90_v13 = vshrl.u32 %v81_v11, 7  ;;  %s280_s0 = smov [#allocation10]  }
   0xe   :  { %46 = vst [vmem:[#allocation4] sm:$0xf] %v278_v0  ;;  %s169_s1 = sshll.u32 %s280_s0, 4  ;;  %s171_s21 = sshll.u32 %s313_s2, 4  ;;  %vm162_vm12 = vcmask 0   ;;  %s170_s1 = int_to_ptr.vmem [resolvable:$true] %s169_s1  ;;  %s172_s21 = int_to_ptr.hbm [resolvable:$true] %s171_s21 }
   0xf   :  { %v51_v4 = vmax.f32 %v49_v2, %v50_v3  ;;  %vm86_vm1 = vcmp.lt.s32.totalorder %v82_v12, 16  ;;  %vm93_vm2 = vcmp.eq.s32.totalorder %v189_v14, %v90_v13 }
  0x10   :  { %v182_v16 = vsel %vm86_vm1, 1.0, %v278_v0  ;;  %v183_v17 = vsel %vm93_vm2, 1.0, %v278_v0 }
  0x11   :  { %v52_v5 = vrot.slane %v51_v4, 2  ;;  %v96_v20 = vmul.f32 %v183_v17, %v182_v16 }
  0x13   :  { %v53_v6 = vmax.f32 %v51_v4, %v52_v5  ;;  %v98_v43 = vld [vmem:[#allocation2] sm:$0xf] }
  0x14   :  { %v102_v41 = vld [vmem:[#allocation3] sm:$0xf] }
  0x15   :  { %v54_v7 = vrot.slane %v53_v6, 1  ;;  %v105_v21 = vld [vmem:[#allocation4] sm:$0xf] }
  0x16   :  { %v106_v23 = vadd.f32 %v105_v21, %v96_v20 }
  0x17   :  { %v55_v8 = vmax.f32 %v53_v6, %v54_v7 }
  0x18   :  { %107 = vst [vmem:[#allocation4] sm:$0xf] %v106_v23 }
  0x19   :  { %v56_v9 = vsub.f32 %v47_v1, %v55_v8 }
  0x1b   :  { %v57_v10 = vmul.f32 1.442695, %v56_v9 }
  0x1d   :  { %190 = vpow2.f32 %v57_v10 }
  0x1f   :  { %v119_v28 = vld [vmem:[#allocation4] sm:$0xf] }
  0x20   :  { %v120_v29 = vsel %vm48_vm0, %v119_v28, 0.0 }
  0x21   :  { %121 = vadd.xlane.f32.xlu1 %v120_v29 }
  0x23   :  { %v191_v15 = vpop.eup %190 }
  0x24   :  { %v59_v18 = vsel %vm48_vm0, %v191_v15, 0.0 }
  0x25   :  { %v60_v19 = vrot.slane %v59_v18, 4 }
  0x27   :  { %v61_v22 = vadd.f32 %v60_v19, %v59_v18 }
  0x29   :  { %v62_v24 = vrot.slane %v61_v22, 2 }
  0x2b   :  { %v63_v25 = vadd.f32 %v62_v24, %v61_v22 }
  0x2d   :  { %v64_v26 = vrot.slane %v63_v25, 1 }
  0x2f   :  { %v65_v27 = vadd.f32 %v64_v26, %v63_v25 }
  0x31   :  { %192 = vrcp.f32 %v65_v27  ;;  %v77_v32 = vand.u32 2147483648, %v65_v27  ;;  %vm71_vm3 = vweird.f32 %v65_v27  ;;  %v75_v34 = vand.u32 2147483647, %v65_v27 }
  0x33   :  { %v78_v36 = vor.u32 1.1754944e-38, %v77_v32  ;;  %vm76_vm6 = vcmp.eq.f32.partialorder %v75_v34, 8.507059e+37 }
  0x37   :  { %v193_v30 = vpop.eup %192 }
  0x38   :  { %v67_v31 = vmul.f32 %v193_v30, %v65_v27  ;;  %vm72_vm4 = vweird.f32 %v193_v30 }
  0x39   :  { %vm73_vm5 = vmor %vm71_vm3, %vm72_vm4 }
  0x3a   :  { %v68_v33 = vsub.f32 1.0, %v67_v31 }
  0x3c   :  { %v69_v35 = vmul.f32 %v193_v30, %v68_v33 }
  0x3e   :  { %v70_v37 = vadd.f32 %v193_v30, %v69_v35 }
  0x40   :  { %v74_v38 = vsel %vm73_vm5, %v193_v30, %v70_v37 }
  0x41   :  { %v79_v39 = vsel %vm76_vm6, %v78_v36, %v74_v38 }
  0x42   :  { %v80_v40 = vmul.f32 %v191_v15, %v79_v39 }
  0x44   :  { %v97_v42 = vmul.f32 %v182_v16, %v80_v40 }
  0x46   :  { %v99_v44 = vmul.f32 %v97_v42, %v96_v20  ;;  %v103_v45 = vadd.f32 %v102_v41, %v97_v42 }
  0x48   :  { %v100_v46 = vadd.f32 %v99_v44, %v98_v43  ;;  %104 = vst [vmem:[#allocation3] sm:$0xf] %v103_v45 }
  0x4a   :  { %101 = vst [vmem:[#allocation2] sm:$0xf] %v100_v46 }
  0x4f   :  { %v115_v49 = vld [vmem:[#allocation3] sm:$0xf] }
  0x50   :  { %v116_v50 = vsel %vm48_vm0, %v115_v49, 0.0 }
  0x51   :  { %v111_v47 = vld [vmem:[#allocation2] sm:$0xf] }
  0x52   :  { %v112_v48 = vsel %vm48_vm0, %v111_v47, 0.0 }
  0x53   :  { %113 = vadd.xlane.f32.xlu0 %v112_v48 }
  0x5b   :  { %117 = vadd.xlane.f32.xlu0 %v116_v50 }
  0x94   :  { %v122_v52 = vpop.xlane.xlu1 %121 }
  0xc6   :  { %v114_v51 = vpop.xlane.xlu0 %113 }
  0xc7   :  { %v124_v54 = vsub.f32 %v122_v52, %v114_v51  ;;  %v125_v7 = vadd.f32 1e-06, %v114_v51 }
  0xc9   :  { %v128_v57 = vmul.f32 0.3, %v124_v54 }
  0xce   :  { %v118_v53 = vpop.xlane.xlu0 %117 }
  0xcf   :  { %v123_v55 = vsub.f32 %v118_v53, %v114_v51 }
  0xd1   :  { %v126_v56 = vmul.f32 0.7, %v123_v55 }
  0xd3   :  { %v127_v58 = vadd.f32 %v126_v56, %v114_v51 }
  0xd5   :  { %v129_v59 = vadd.f32 %v128_v57, %v127_v58 }
  0xd7   :  { %v130_v60 = vadd.f32 1e-06, %v129_v59 }
  0xd9   :  { %194 = vrcp.f32 %v130_v60  ;;  %v142_v1 = vand.u32 2147483648, %v130_v60  ;;  %v140_v3 = vand.u32 2147483647, %v130_v60  ;;  %vm136_vm8 = vweird.f32 %v130_v60 }
  0xda   :  { %196 = vrcp.f32 %v279_v62 }
  0xdb   :  { %v143_v6 = vor.u32 1.1754944e-38, %v142_v1  ;;  %vm141_vm10 = vcmp.eq.f32.partialorder %v140_v3, 8.507059e+37 }
  0xdf   :  { %v195_v61 = vpop.eup %194 }
  0xe0   :  { %v132_v63 = vmul.f32 %v195_v61, %v130_v60  ;;  %vm137_vm7 = vweird.f32 %v195_v61  ;;  %v197_v4 = vpop.eup %196 }
  0xe1   :  { %vm138_vm9 = vmor %vm136_vm8, %vm137_vm7  ;;  %v155_v9 = vmul.f32 4.0, %v197_v4  ;;  %vm159_vm11 = vweird.f32 %v197_v4 }
  0xe2   :  { %v133_v0 = vsub.f32 1.0, %v132_v63 }
  0xe3   :  { %v156_v13 = vsub.f32 1.0, %v155_v9 }
  0xe4   :  { %v134_v2 = vmul.f32 %v195_v61, %v133_v0 }
  0xe5   :  { %v157_v16 = vmul.f32 %v197_v4, %v156_v13 }
  0xe6   :  { %v135_v5 = vadd.f32 %v195_v61, %v134_v2 }
  0xe7   :  { %v158_v19 = vadd.f32 %v197_v4, %v157_v16 }
  0xe8   :  { %v139_v8 = vsel %vm138_vm9, %v195_v61, %v135_v5 }
  0xe9   :  { %v144_v10 = vsel %vm141_vm10, %v143_v6, %v139_v8  ;;  %v160_v22 = vsel %vm159_vm11, %v197_v4, %v158_v19 }
  0xea   :  { %v145_v11 = vmul.f32 %v144_v10, %v125_v7 }
  0xec   :  { %v146_v12 = vsub.f32 1.0, %v145_v11 }
  0xee   :  { %v147_v14 = vsel %vm48_vm0, %v146_v12, 0.0 }
  0xef   :  { %v148_v15 = vrot.slane %v147_v14, 4 }
  0xf1   :  { %v149_v17 = vadd.f32 %v148_v15, %v147_v14 }
  0xf3   :  { %v150_v18 = vrot.slane %v149_v17, 2 }
  0xf5   :  { %v151_v20 = vadd.f32 %v150_v18, %v149_v17 }
  0xf7   :  { %v152_v21 = vrot.slane %v151_v20, 1 }
  0xf9   :  { %v153_v23 = vadd.f32 %v152_v21, %v151_v20 }
  0xfb   :  { %v161_v24 = vmul.f32 %v160_v22, %v153_v23 }
  0xfd   :  { %163 = vst.msk [vmem:[#allocation10] sm:$0x1] %vm162_vm12, %v161_v24 }
  0xfe   :  { %174 = dma.vmem_to_hbm [thread:$0]  %s170_s1, 16, %s172_s21, [#allocation7]  }
  0xff   :  { %274 = dma.done.wait [#allocation7], 16  }
 0x100   :  { %275 = vsyncadd [#allocation7], 4294967280 }
 0x101   :  { %179 = vsyncpa [#allocation6], 1 }
 0x102   :  { %180 = vsyncpa [#allocation9], 1 }
 0x103   :  { %181 = vsyncpa [#allocation7], 1 }

</bundles_post_ra>
